<compile_context>
chip_gen: v5e
topology: v5e:2x2
jax: 0.10.0
libtpu: 0.0.40
codegen_flags: <defaults>
</compile_context>

<pallas_src>
import functools

import jax
import jax.numpy as jnp
from jax.experimental import pallas as pl
from jax.experimental.pallas import tpu as pltpu


def _fused_heads_kernel(x_ref, wpb_ref, wvb_ref, pol_ref, val_ref, *, state_space):
    """One batch tile of the folded network.

    x_ref   : (TILE_B, S)   input rows
    wpb_ref : (S + 1, A)    rows 0..S-1 = Wh @ Wp (folded), row S = bh @ Wp + bp
    wvb_ref : (S + 1, 1)    rows 0..S-1 = Wh @ Wv (folded), row S = bh @ Wv + bv
    pol_ref : (TILE_B, A)   tanh(policy logits)
    val_ref : (TILE_B, 1)   value
    """
    S = state_space
    x = x_ref[...]                                             # (TB, S)

    wp = wpb_ref[:S, :]                                        # (S, A)
    bp = wpb_ref[S:, :]                                        # (1, A)
    wv = wvb_ref[:S, :]                                        # (S, 1)
    bv = wvb_ref[S:, :]                                        # (1, 1)

    pol = jnp.dot(x, wp, preferred_element_type=jnp.float32) + bp
    val = jnp.dot(x, wv, preferred_element_type=jnp.float32) + bv

    pol_ref[...] = jnp.tanh(pol).astype(pol_ref.dtype)
    val_ref[...] = val.astype(val_ref.dtype)


def fold_params(params):
    """Algebraically fold hidden->head linears (valid: no activation on hid).

    Returns packed buffers with the bias appended as an extra row, so the
    kernel needs only two small resident weight inputs.
    """
    wh, bh = params["wh"], params["bh"]   # (S, 16), (1, 16)
    wp, bp = params["wp"], params["bp"]   # (16, A), (1, A)
    wv, bv = params["wv"], params["bv"]   # (16, 1), (1, 1)
    wpb = jnp.concatenate([wh @ wp, bh @ wp + bp], axis=0)     # (S+1, A)
    wvb = jnp.concatenate([wh @ wv, bh @ wv + bv], axis=0)     # (S+1, 1)
    return {"wpb": wpb, "wvb": wvb}


def _round_up(n, m):
    return ((n + m - 1) // m) * m


def model_forward(x, folded):
    """x: (batch, state_space) float32. folded: output of fold_params."""
    wpb = folded["wpb"]                   # (S+1, A)
    wvb = folded["wvb"]                   # (S+1, 1)
    S = wpb.shape[0] - 1
    A = wpb.shape[1]
    B = x.shape[0]

    # --- batch tiling: tight tiles, multiple of 8, <= 2048 rows each, and
    #     >= 2 grid steps when the batch allows (v7x has 2 TensorCores). ---
    CAP = 2048
    min_tiles = 2 if B >= 16 else 1
    num_tiles = max((B + CAP - 1) // CAP, min_tiles)
    TILE_B = _round_up((B + num_tiles - 1) // num_tiles, 8)
    num_tiles = (B + TILE_B - 1) // TILE_B
    Bp = num_tiles * TILE_B

    x_p = jnp.pad(x, ((0, Bp - B), (0, 0))) if Bp != B else x

    kernel = functools.partial(_fused_heads_kernel, state_space=S)

    policy, value = pl.pallas_call(
        kernel,
        out_shape=(
            jax.ShapeDtypeStruct((Bp, A), jnp.float32),
            jax.ShapeDtypeStruct((Bp, 1), jnp.float32),
        ),
        grid_spec=pltpu.PrefetchScalarGridSpec(
            num_scalar_prefetch=0,
            grid=(num_tiles,),
            in_specs=[
                pl.BlockSpec((TILE_B, S), lambda i: (i, 0)),   # x tile (pipelined)
                pl.BlockSpec((S + 1, A), lambda i: (0, 0)),    # folded policy W+b (resident)
                pl.BlockSpec((S + 1, 1), lambda i: (0, 0)),    # folded value  W+b (resident)
            ],
            out_specs=[
                pl.BlockSpec((TILE_B, A), lambda i: (i, 0)),   # policy tile
                pl.BlockSpec((TILE_B, 1), lambda i: (i, 0)),   # value tile
            ],
        ),
        compiler_params=pltpu.CompilerParams(
            dimension_semantics=("parallel",)),
    )(x_p, wpb, wvb)

    if Bp != B:  # only batch-padding (if any) needs trimming; it is a cheap
        policy = policy[:B]   # contiguous leading-dim slice.
        value = value[:B]
    return policy, value


def init_params(key, state_space, act_n):
    """Deterministic init mirroring the torch module's parameter shapes.

    torch stores Linear weights as (out, in); we keep them (in, out) so the
    math is x @ W directly.
    """
    k1, k2, k3, k4, k5, k6 = jax.random.split(key, 6)
    scale_h = 1.0 / jnp.sqrt(state_space)
    scale_p = 1.0 / jnp.sqrt(16.0)
    return {
        "wh": jax.random.uniform(k1, (state_space, 16), jnp.float32, -scale_h, scale_h),
        "bh": jax.random.uniform(k2, (1, 16), jnp.float32, -scale_h, scale_h),
        "wp": jax.random.uniform(k3, (16, act_n), jnp.float32, -scale_p, scale_p),
        "bp": jax.random.uniform(k4, (1, act_n), jnp.float32, -scale_p, scale_p),
        "wv": jax.random.uniform(k5, (16, 1), jnp.float32, -scale_p, scale_p),
        "bv": jax.random.uniform(k6, (1, 1), jnp.float32, -scale_p, scale_p),
    }


if __name__ == "__main__":
    key = jax.random.PRNGKey(0)
    kx, kp = jax.random.split(key)

    state_space = 32
    act_n = 4
    batch = 8

    x = jax.random.normal(kx, (batch, state_space), jnp.float32)
    params = init_params(kp, state_space, act_n)
    folded = fold_params(params)   # one-time param-prep (outside the kernel)

    fwd = jax.jit(model_forward)
    policy, value = fwd(x, folded)
    jax.block_until_ready((policy, value))

    # Pure-JAX reference check against the UNFOLDED two-layer math.
    hid_ref = x @ params["wh"] + params["bh"]
    pol_ref = jnp.tanh(hid_ref @ params["wp"] + params["bp"])
    val_ref = hid_ref @ params["wv"] + params["bv"]
    assert policy.shape == (batch, act_n) and value.shape == (batch, 1)
    assert jnp.allclose(policy, pol_ref, atol=1e-4)
    assert jnp.allclose(value, val_ref, atol=1e-4)

    print("KERNEL_OK")
</pallas_src>

<mosaic_0001>
module attributes {stable_mosaic.version = 11 : i64} {
  func.func @_fused_heads_kernel(%arg0: i32, %arg1: memref<8x32xf32, #tpu.memory_space<vmem>>, %arg2: memref<33x4xf32, #tpu.memory_space<vmem>>, %arg3: memref<33x1xf32, #tpu.memory_space<vmem>>, %arg4: memref<8x4xf32, #tpu.memory_space<vmem>>, %arg5: memref<8x1xf32, #tpu.memory_space<vmem>>) attributes {dimension_semantics = [#tpu.dimension_semantics<parallel>], iteration_bounds = array<i64: 1>, scalar_prefetch = 0 : i64, scratch_operands = 0 : i64, tpu.core_type = #tpu.core_type<tc>, window_params = [{transform_indices = @transform_0, window_bounds = array<i64: 8, 32>}, {pipeline_mode = #tpu.pipeline_mode<synchronous>, transform_indices = @transform_1, window_bounds = array<i64: 33, 4>}, {pipeline_mode = #tpu.pipeline_mode<synchronous>, transform_indices = @transform_2, window_bounds = array<i64: 33, 1>}, {transform_indices = @transform_3, window_bounds = array<i64: 8, 4>}, {transform_indices = @transform_4, window_bounds = array<i64: 8, 1>}]} {
    %c0 = arith.constant 0 : index
    %c0_0 = arith.constant 0 : index
    %0 = vector.load %arg1[%c0, %c0_0] : memref<8x32xf32, #tpu.memory_space<vmem>>, vector<8x32xf32>
    %c0_1 = arith.constant 0 : index
    %c0_2 = arith.constant 0 : index
    %1 = vector.load %arg2[%c0_1, %c0_2] : memref<33x4xf32, #tpu.memory_space<vmem>>, vector<32x4xf32>
    %c32 = arith.constant 32 : index
    %c0_3 = arith.constant 0 : index
    %2 = vector.load %arg2[%c32, %c0_3] : memref<33x4xf32, #tpu.memory_space<vmem>>, vector<1x4xf32>
    %c0_4 = arith.constant 0 : index
    %c0_5 = arith.constant 0 : index
    %3 = vector.load %arg3[%c0_4, %c0_5] : memref<33x1xf32, #tpu.memory_space<vmem>>, vector<32x1xf32>
    %c32_6 = arith.constant 32 : index
    %c0_7 = arith.constant 0 : index
    %4 = vector.load %arg3[%c32_6, %c0_7] : memref<33x1xf32, #tpu.memory_space<vmem>>, vector<1x1xf32>
    %cst = arith.constant dense<0.000000e+00> : vector<8x4xf32>
    %5 = tpu.matmul %0, %1, %cst {dimension_numbers = #tpu.dot_dimension_numbers<[1], [0], [0], [1], [0, 0, 1, 1], [], []>} : vector<8x32xf32>, vector<32x4xf32>, vector<8x4xf32> -> vector<8x4xf32>
    %6 = vector.broadcast %2 : vector<1x4xf32> to vector<8x4xf32>
    %7 = arith.addf %5, %6 : vector<8x4xf32>
    %cst_8 = arith.constant dense<0.000000e+00> : vector<8x1xf32>
    %8 = tpu.matmul %0, %3, %cst_8 {dimension_numbers = #tpu.dot_dimension_numbers<[1], [0], [0], [1], [0, 0, 1, 1], [], []>} : vector<8x32xf32>, vector<32x1xf32>, vector<8x1xf32> -> vector<8x1xf32>
    %9 = vector.broadcast %4 : vector<1x1xf32> to vector<8x1xf32>
    %10 = arith.addf %8, %9 : vector<8x1xf32>
    %11 = math.tanh %7 : vector<8x4xf32>
    %c0_9 = arith.constant 0 : index
    %c0_10 = arith.constant 0 : index
    %12 = vector.load %arg4[%c0_9, %c0_10] : memref<8x4xf32, #tpu.memory_space<vmem>>, vector<8x4xf32>
    tpu.vector_store %arg4[%c0_9, %c0_10], %11 {strides = array<i32>} : memref<8x4xf32, #tpu.memory_space<vmem>>, vector<8x4xf32>,
    %c0_11 = arith.constant 0 : index
    %c0_12 = arith.constant 0 : index
    %13 = vector.load %arg5[%c0_11, %c0_12] : memref<8x1xf32, #tpu.memory_space<vmem>>, vector<8x1xf32>
    tpu.vector_store %arg5[%c0_11, %c0_12], %10 {strides = array<i32>} : memref<8x1xf32, #tpu.memory_space<vmem>>, vector<8x1xf32>,
    return
  }
  func.func @transform_0(%arg0: i32) -> (i32, i32) {
    %c0_i32 = arith.constant 0 : i32
    %c0_i32_0 = arith.constant 0 : i32
    return %arg0, %c0_i32 : i32, i32
  }
  func.func @transform_1(%arg0: i32) -> (i32, i32) {
    %c0_i32 = arith.constant 0 : i32
    %c0_i32_0 = arith.constant 0 : i32
    %c0_i32_1 = arith.constant 0 : i32
    return %c0_i32, %c0_i32_0 : i32, i32
  }
  func.func @transform_2(%arg0: i32) -> (i32, i32) {
    %c0_i32 = arith.constant 0 : i32
    %c0_i32_0 = arith.constant 0 : i32
    %c0_i32_1 = arith.constant 0 : i32
    return %c0_i32, %c0_i32_0 : i32, i32
  }
  func.func @transform_3(%arg0: i32) -> (i32, i32) {
    %c0_i32 = arith.constant 0 : i32
    %c0_i32_0 = arith.constant 0 : i32
    return %arg0, %c0_i32 : i32, i32
  }
  func.func @transform_4(%arg0: i32) -> (i32, i32) {
    %c0_i32 = arith.constant 0 : i32
    %c0_i32_0 = arith.constant 0 : i32
    return %arg0, %c0_i32 : i32, i32
  }
}

</mosaic_0001>

<bundles_post_ra>
// kernel: model_forward.1
= control target key start
LH: loop header
LB: loop body
LE: loop exit
PB: predicated region body
PF: predicated region fallthrough
CT: control target
= control target key end

     0   :  { %vm28_vm0 = vcmask 261120   ;;  %vm76_vm1 = vcmask 7168   ;;  %vm74_vm2 = vcmask 31744   ;;  %s156_s1 = inlined_call_operand.vmem [shape: f32[33,4], index: 1, kind: input, shape index: {}]   ;;  %s157_s2 = inlined_call_operand.vmem [shape: f32[33,1], index: 2, kind: input, shape index: {}]   ;;  %s158_s0 = inlined_call_operand.vmem [shape: f32[8,32], index: 0, kind: input, shape index: {}]   ;;  %s159_s4 = inlined_call_operand.vmem [shape: f32[8,1], index: 4, kind: output, shape index: {1}]   ;;  %s160_s3 = inlined_call_operand.vmem [shape: f32[8,4], index: 3, kind: output, shape index: {0}]  }
   0x1   :  { %v20_v0 = vld [vmem:[%s156_s1 + $0x18] sm:$0xff]  ;;  %v19_v1 = vld [vmem:[%s156_s1 + $0x10] sm:$0xff]  ;;  %v18_v3 = vld [vmem:[%s156_s1 + $0x8] sm:$0xff] }
   0x2   :  { %44 = vmatpush.msra.mxu0 %v20_v0  ;;  %v25_v2 = vld [vmem:[%s157_s2 + $0x18] sm:$0xff]  ;;  %v24_v4 = vld [vmem:[%s157_s2 + $0x10] sm:$0xff]  ;;  %v23_v5 = vld [vmem:[%s157_s2 + $0x8] sm:$0xff] }
   0x3   :  { %65 = vmatpush.msra.mxu1 %v25_v2  ;;  %v17_v6 = vld [vmem:[%s156_s1] sm:$0xff] }
   0x4   :  { %45 = vmatpush.msra.mxu0 %v19_v1  ;;  %v16_v7 = vld [vmem:[%s158_s0] sm:$0xff] }
   0x5   :  { %66 = vmatpush.msra.mxu1 %v24_v4  ;;  %v22_v8 = vld [vmem:[%s157_s2] sm:$0xff] }
   0x6   :  { %46 = vmatpush.msra.mxu0 %v18_v3  ;;  %v88_v9 = vld [vmem:[%s156_s1 + $0x20] ss:$0 sm:$0xff] }
   0x7   :  { %67 = vmatpush.msra.mxu1 %v23_v5  ;;  %v89_v10 = vld [vmem:[%s157_s2 + $0x20] ss:$0 sm:$0xff] }
   0x8   :  { %47 = vmatpush.msra.mxu0 %v17_v6 }
   0x9   :  { %86 = vmatmul.msk.f32.vlgmr.msra.gmra.mxu0 %vm28_vm0, %v16_v7  ;;  %68 = vmatpush.msra.mxu1 %v22_v8 }
   0xa   :  { %87 = vmatmul.msk.f32.vlgmr.msra.gmra.mxu1 %vm28_vm0, %v16_v7 }
  0x86   :  { %v49_v11 = vpop.f32.mrf.mxu0 }
  0x87   :  { %v50_v12 = vadd.f32 %v88_v9, %v49_v11  ;;  %v70_v13 = vpop.f32.mrf.mxu1 }
  0x88   :  { %v71_v14 = vadd.f32 %v89_v10, %v70_v13 }
  0x89   :  { %90 = vtanh.f32 %v50_v12 }
  0x8a   :  { %77 = vst.msk [vmem:[%s159_s4] sm:$0xff] %vm76_vm1, %v71_v14 }
  0x8f   :  { %v91_v15 = vpop.eup %90 }
  0x90   :  { %75 = vst.msk [vmem:[%s160_s3] sm:$0xff] %vm74_vm2, %v91_v15 }

</bundles_post_ra>
